<compile_context>
chip_gen: v6e
topology: v6e:2x2x1
jax: 0.10.0
libtpu: 0.0.40
codegen_flags: <defaults>
</compile_context>

<pallas_src>
import functools

import jax
import jax.numpy as jnp
from jax.experimental import pallas as pl
from jax.experimental.pallas import tpu as pltpu

LANE = 128
SUBLANE = 8
TARGET_ROWS = 2048  # 2048*128*4B = 1 MiB f32 per block


def _lsq_fakequant_kernel(scale_ref, zp_ref, x_ref, o_ref, *, quant_min, quant_max):
    # scale_ref / zp_ref live in SMEM (scalar prefetch) -> scalar-unit math only.
    s = scale_ref[0]
    inv_s = 1.0 / s                      # exact scalar divide, hoisted out of the vector loop
    zp = zp_ref[0].astype(jnp.float32)
    zp_s = zp * s                        # folded zero-point term

    x = x_ref[...].astype(jnp.float32)
    q = jnp.round(x * inv_s) + zp
    q = jnp.clip(q, float(quant_min), float(quant_max))
    o_ref[...] = (q * s - zp_s).astype(o_ref.dtype)


def _run_kernel(x2, s, zp, quant_min, quant_max, out_dtype):
    rows = x2.shape[0]
    # Block row count: full extent when small (always legal), otherwise a large
    # multiple-of-8 tile; the final partial block is masked by Pallas.
    block_rows = rows if rows <= TARGET_ROWS else TARGET_ROWS
    grid = (pl.cdiv(rows, block_rows),)

    kernel = functools.partial(
        _lsq_fakequant_kernel, quant_min=quant_min, quant_max=quant_max
    )

    return pl.pallas_call(
        kernel,
        out_shape=jax.ShapeDtypeStruct(x2.shape, out_dtype),
        grid_spec=pltpu.PrefetchScalarGridSpec(
            num_scalar_prefetch=2,  # scale, zero_point land in SMEM
            grid=grid,
            in_specs=[
                pl.BlockSpec((block_rows, LANE), lambda i, s_ref, z_ref: (i, 0)),
            ],
            out_specs=pl.BlockSpec((block_rows, LANE), lambda i, s_ref, z_ref: (i, 0)),
        ),
        compiler_params=pltpu.CompilerParams(
            dimension_semantics=("parallel",),
        ),
    )(s, zp, x2)


def lsq_fake_quantize(x, scale, zero_point, *, bit=8, symmetric=False):
    """Per-tensor LSQ fake quantization (forward)."""
    if symmetric:
        quant_min, quant_max = -(2 ** (bit - 1)), 2 ** (bit - 1) - 1
    else:
        quant_min, quant_max = 0, 2 ** bit - 1

    # Parameter setup (mirrors: self.scale.data.abs_(); .clamp_(min=eps))
    eps = jnp.finfo(jnp.float32).eps
    s = jnp.maximum(jnp.abs(scale.astype(jnp.float32)), eps).reshape((1,))
    zp = zero_point.astype(jnp.int32).reshape((1,))

    orig_shape = x.shape
    orig_dtype = x.dtype
    n = x.size

    if n % LANE == 0:
        # Fast path: layout-preserving reshape to a lane-dense (rows, 128) view;
        # no padding copy, no tail slice.
        x2 = x.reshape(n // LANE, LANE)
        out2 = _run_kernel(x2, s, zp, quant_min, quant_max, orig_dtype)
        return out2.reshape(orig_shape)

    # Rare fallback: total element count not a multiple of 128.
    # TODO(synk): handle the <128-element tail separately to avoid the full-tensor pad/slice copies.
    flat = x.reshape(-1)
    pad = (-n) % (SUBLANE * LANE)
    flat = jnp.pad(flat, (0, pad))
    x2 = flat.reshape(-1, LANE)
    out2 = _run_kernel(x2, s, zp, quant_min, quant_max, orig_dtype)
    return out2.reshape(-1)[:n].reshape(orig_shape)


def _reference(x, scale, zero_point, *, bit=8, symmetric=False):
    # Mirrors PyTorch per-tensor fake-quant; uses the same exact-scalar-inverse
    # multiply as the kernel so the comparison is bit-tight (a true per-element
    # divide can differ by one quantization code only at exact rounding ties).
    if symmetric:
        quant_min, quant_max = -(2 ** (bit - 1)), 2 ** (bit - 1) - 1
    else:
        quant_min, quant_max = 0, 2 ** bit - 1
    eps = jnp.finfo(jnp.float32).eps
    s = jnp.maximum(jnp.abs(scale.astype(jnp.float32)), eps)[0]
    zp = zero_point.astype(jnp.float32)[0]
    inv_s = 1.0 / s
    q = jnp.clip(jnp.round(x.astype(jnp.float32) * inv_s) + zp, quant_min, quant_max)
    return (q * s - zp * s).astype(x.dtype)


if __name__ == "__main__":
    key = jax.random.PRNGKey(0)

    # NCHW input, matching the PyTorch convention for activations.
    x = jax.random.normal(key, (2, 4, 16, 16), dtype=jnp.float32)

    # Module __init__ defaults are scale=[1.0], zero_point=[0]; use non-trivial
    # values to exercise the quantization math.
    scale = jnp.array([0.05], dtype=jnp.float32)
    zero_point = jnp.array([12], dtype=jnp.int32)

    out = lsq_fake_quantize(x, scale, zero_point, bit=8, symmetric=False)
    out = jax.block_until_ready(out)

    ref = _reference(x, scale, zero_point, bit=8, symmetric=False)
    assert out.shape == x.shape and out.dtype == x.dtype
    assert jnp.max(jnp.abs(out - ref)) <= 1e-6

    print("KERNEL_OK")
</pallas_src>

<mosaic_0001>
module attributes {stable_mosaic.version = 11 : i64} {
  func.func @_lsq_fakequant_kernel(%arg0: i32, %arg1: memref<1xf32, #tpu.memory_space<smem>>, %arg2: memref<1xi32, #tpu.memory_space<smem>>, %arg3: memref<16x128xf32, #tpu.memory_space<vmem>>, %arg4: memref<16x128xf32, #tpu.memory_space<vmem>>) attributes {dimension_semantics = [#tpu.dimension_semantics<parallel>], iteration_bounds = array<i64: 1>, scalar_prefetch = 2 : i64, scratch_operands = 0 : i64, tpu.core_type = #tpu.core_type<tc>, window_params = [{transform_indices = @transform_0, window_bounds = array<i64: 16, 128>}, {transform_indices = @transform_1, window_bounds = array<i64: 16, 128>}]} {
    %c0 = arith.constant 0 : index
    %0 = memref.load %arg1[%c0] : memref<1xf32, #tpu.memory_space<smem>>
    %cst = arith.constant 1.000000e+00 : f32
    %1 = arith.divf %cst, %0 : f32
    %c0_0 = arith.constant 0 : index
    %2 = memref.load %arg2[%c0_0] : memref<1xi32, #tpu.memory_space<smem>>
    %3 = arith.sitofp %2 : i32 to f32
    %4 = arith.mulf %3, %0 : f32
    %c0_1 = arith.constant 0 : index
    %c0_2 = arith.constant 0 : index
    %5 = vector.load %arg3[%c0_1, %c0_2] : memref<16x128xf32, #tpu.memory_space<vmem>>, vector<16x128xf32>
    %6 = vector.broadcast %1 : f32 to vector<16x128xf32>
    %7 = arith.mulf %5, %6 : vector<16x128xf32>
    %8 = math.roundeven %7 : vector<16x128xf32>
    %9 = vector.broadcast %3 : f32 to vector<16x128xf32>
    %10 = arith.addf %8, %9 : vector<16x128xf32>
    %cst_3 = arith.constant 0.000000e+00 : f32
    %cst_4 = arith.constant 2.550000e+02 : f32
    %11 = vector.broadcast %cst_3 : f32 to vector<16x128xf32>
    %12 = arith.maximumf %11, %10 : vector<16x128xf32>
    %13 = vector.broadcast %cst_4 : f32 to vector<16x128xf32>
    %14 = arith.minimumf %13, %12 : vector<16x128xf32>
    %15 = vector.broadcast %0 : f32 to vector<16x128xf32>
    %16 = arith.mulf %14, %15 : vector<16x128xf32>
    %17 = vector.broadcast %4 : f32 to vector<16x128xf32>
    %18 = arith.subf %16, %17 : vector<16x128xf32>
    %c0_5 = arith.constant 0 : index
    %c0_6 = arith.constant 0 : index
    %19 = vector.load %arg4[%c0_5, %c0_6] : memref<16x128xf32, #tpu.memory_space<vmem>>, vector<16x128xf32>
    tpu.vector_store %arg4[%c0_5, %c0_6], %18 {strides = array<i32>} : memref<16x128xf32, #tpu.memory_space<vmem>>, vector<16x128xf32>,
    return
  }
  func.func @transform_0(%arg0: i32, %arg1: memref<1xf32, #tpu.memory_space<smem>>, %arg2: memref<1xi32, #tpu.memory_space<smem>>) -> (i32, i32) {
    %c0_i32 = arith.constant 0 : i32
    %c0_i32_0 = arith.constant 0 : i32
    return %arg0, %c0_i32 : i32, i32
  }
  func.func @transform_1(%arg0: i32, %arg1: memref<1xf32, #tpu.memory_space<smem>>, %arg2: memref<1xi32, #tpu.memory_space<smem>>) -> (i32, i32) {
    %c0_i32 = arith.constant 0 : i32
    %c0_i32_0 = arith.constant 0 : i32
    return %arg0, %c0_i32 : i32, i32
  }
}

</mosaic_0001>

<bundles_post_ra>
// kernel: tpu_custom_call.1
= control target key start
LH: loop header
LB: loop body
LE: loop exit
PB: predicated region body
PF: predicated region fallthrough
CT: control target
= control target key end

     0   :  { %10 = vsyncpa [#allocation6], 0  ;;  %s186_s0 = inlined_call_operand.<no memory space> [shape: f32[1], index: 0, kind: input, shape index: {}]   ;;  %s187_s1 = inlined_call_operand.<no memory space> [shape: s32[1], index: 1, kind: input, shape index: {}]   ;;  %s188_s2 = inlined_call_operand.hbm [shape: f32[16,128], index: 2, kind: input, shape index: {}]   ;;  %s189_s3 = inlined_call_operand.hbm [shape: f32[16,128], index: 3, kind: output, shape index: {}]  }
   0x1   :  { %11 = vsyncpa [#allocation7], 0  ;;  %s141_s12 = smov [#allocation5]  }
   0x2   :  { %s17_s13 = sshll.u32 %s141_s12, 4  ;;  %s18_s13 = int_to_ptr.vmem [resolvable:$true] %s17_s13 }
   0x3   :  { %s105_s14 = scalar_lea.vmem %s18_s13, 256  ;;  %p110_p1 = scmp.lt.s32.totalorder %s18_s13, %s18_s13 }
   0x4   :  { %p106_p0 = scmp.ne.s32.totalorder %s18_s13, %s105_s14  ;;  %p111_p2 = scmp.lt.s32.totalorder %s105_s14, %s105_s14 }
   0x6   :  { %p112_p3 = por %p111_p2, %p110_p1 }
   0x8   :  { %p113_p4 = pnand %p112_p3, %p106_p0 }
   0xa   :  { %116 = shalt.err (!%p113_p4)
}
   0xb   :  { %s142_s15 = smov 128   ;;  %s143_s16 = smov 8   ;;  %v28_v0 = vstv %s186_s0 }
   0xc   :  { %23 = dma.hbm_to_vmem [thread:$0]  %s188_s2, 256, %s18_s13, [#allocation6], %s142_s15, %s142_s15, %s143_s16  }
   0xd   :  { %137 = dma.done.wait [#allocation6], 256  }
   0xe   :  { %138 = vsyncadd [#allocation6], 4294967040  ;;  %95 = vrcp.f32 %v28_v0  ;;  %v34_v2 = vld [vmem:[#allocation5] sm:$0xff]  ;;  %v35_v3 = vld [vmem:[#allocation5 + $0x8] sm:$0xff]  ;;  %s32_s23 = scvt.s32.f32 %s187_s1  ;;  %s144_s1 = smov [#allocation8]  }
   0xf   :  { %s61_s27 = sshll.u32 %s144_s1, 4  ;;  %s62_s27 = int_to_ptr.vmem [resolvable:$true] %s61_s27 }
  0x10   :  { %v41_v18 = vstv %s32_s23  ;;  %s33_s26 = smul.f32 %s32_s23, %s186_s0  ;;  %s117_s28 = scalar_lea.vmem %s62_s27, 256 }
  0x11   :  { %p118_p5 = scmp.ne.s32.totalorder %s62_s27, %s117_s28  ;;  %p122_p6 = scmp.lt.s32.totalorder %s62_s27, %s62_s27 }
  0x12   :  { %v51_v28 = vstv %s33_s26  ;;  %p123_p7 = scmp.lt.s32.totalorder %s117_s28, %s117_s28 }
  0x14   :  { %p124_p8 = por %p123_p7, %p122_p6 }
  0x16   :  { %p125_p9 = pnand %p124_p8, %p118_p5 }
  0x1b   :  { %v96_v1 = vpop.eup %95 }
  0x1c   :  { %73 = vpush %v96_v1 }
  0x4d   :  { %s74_s21 = spop %73 }
  0x4e   :  { %v36_v4 = vstv %s74_s21 }
  0x4f   :  { %v37_v5 = vmul.f32 %v36_v4, %v34_v2  ;;  %v38_v6 = vmul.f32 %v36_v4, %v35_v3 }
  0x51   :  { %v77_v7 = vcvt.f32.s32 %v37_v5  ;;  %v85_v8 = vcvt.f32.s32 %v38_v6  ;;  %v75_v10 = vand.u32 2147483647, %v37_v5  ;;  %v80_v13 = vand.u32 2147483648, %v37_v5 }
  0x52   :  { %v83_v14 = vand.u32 2147483647, %v38_v6  ;;  %v88_v16 = vand.u32 2147483648, %v38_v6 }
  0x53   :  { %v78_v9 = vcvt.s32.f32 %v77_v7  ;;  %v86_v11 = vcvt.s32.f32 %v85_v8  ;;  %vm76_vm0 = vcmp.lt.f32.partialorder %v75_v10, 8388608.0 }
  0x54   :  { %vm84_vm1 = vcmp.lt.f32.partialorder %v83_v14, 8388608.0 }
  0x55   :  { %v79_v12 = vand.u32 2147483647, %v78_v9  ;;  %v87_v15 = vand.u32 2147483647, %v86_v11 }
  0x57   :  { %v81_v17 = vor.u32 %v80_v13, %v79_v12  ;;  %v89_v19 = vor.u32 %v88_v16, %v87_v15 }
  0x59   :  { %v82_v20 = vsel %vm76_vm0, %v81_v17, %v37_v5  ;;  %v90_v21 = vsel %vm84_vm1, %v89_v19, %v38_v6 }
  0x5a   :  { %v42_v22 = vadd.f32 %v82_v20, %v41_v18  ;;  %v43_v23 = vadd.f32 %v90_v21, %v41_v18 }
  0x5c   :  { %v44_v24 = vmax.f32 %v42_v22, 0.0  ;;  %v45_v25 = vmax.f32 %v43_v23, 0.0 }
  0x5e   :  { %v46_v26 = vmin.f32 %v44_v24, 255.0  ;;  %v47_v27 = vmin.f32 %v45_v25, 255.0 }
  0x60   :  { %v49_v29 = vmul.f32 %v46_v26, %v28_v0  ;;  %v50_v30 = vmul.f32 %v47_v27, %v28_v0 }
  0x62   :  { %v52_v31 = vsub.f32 %v49_v29, %v51_v28  ;;  %v53_v32 = vsub.f32 %v50_v30, %v51_v28 }
  0x64   :  { %54 = vst [vmem:[#allocation8] sm:$0xff] %v52_v31  ;;  %55 = vst [vmem:[#allocation8 + $0x8] sm:$0xff] %v53_v32 }
  0x65   :  { %128 = shalt.err (!%p125_p9)
}
  0x66   :  { %67 = dma.vmem_to_hbm [thread:$0]  %s62_s27, 256, %s189_s3, [#allocation7], %s142_s15, %s142_s15, %s143_s16  }
  0x67   :  { %139 = dma.done.wait [#allocation7], 256  }
  0x68   :  { %140 = vsyncadd [#allocation7], 4294967040 }
  0x69   :  { %71 = vsyncpa [#allocation6], 1 }
  0x6a   :  { %72 = vsyncpa [#allocation7], 1 }

</bundles_post_ra>
